<compile_context>
chip_gen: v7x
topology: tpu7x:2x2x1
jax: 0.10.0
libtpu: 0.0.40
codegen_flags: <defaults>
</compile_context>

<pallas_src>
import functools
import math

import jax
import jax.numpy as jnp
import numpy as np
from jax import lax
from jax.experimental import pallas as pl
from jax.experimental.pallas import tpu as pltpu


def _sincos_kernel(x_ref, o_ref, *, chans, out_chans, num_bands, fold):
    """One row tile: o = sin(x @ band_mat + phase).

    x_ref: (TM, fold*chans)      input rows (fold logical rows packed along lanes)
    o_ref: (TM, fold*out_chans)  output rows (same fold packing)
    """
    k_dim = fold * chans
    n_dim = fold * out_chans

    row = lax.broadcasted_iota(jnp.int32, (k_dim, n_dim), 0)
    col = lax.broadcasted_iota(jnp.int32, (k_dim, n_dim), 1)

    # Block-diagonal band matrix: band_mat[blk*C + ch, blk*out_c + b*C + ch] = 2**(b%F).
    # Built with compares/selects only (no vector int div/mod), static loop is tiny.
    band_mat = jnp.zeros((k_dim, n_dim), jnp.float32)
    for blk in range(fold):
        row_in_blk = (row >= blk * chans) & (row < (blk + 1) * chans)
        for b in range(2 * num_bands):
            shift = blk * (out_chans - chans) + b * chans
            mask = row_in_blk & (col == row + shift)
            band_mat = jnp.where(
                mask, jnp.float32(2.0 ** (b % num_bands)), band_mat)

    # Per-output-column phase: 0 for the sin half of each block, pi/2 for the cos half.
    colp = lax.broadcasted_iota(jnp.int32, (1, n_dim), 1)
    phase = jnp.zeros((1, n_dim), jnp.float32)
    for blk in range(fold):
        lo = blk * out_chans + num_bands * chans
        hi = (blk + 1) * out_chans
        phase = jnp.where((colp >= lo) & (colp < hi),
                          jnp.float32(np.pi / 2.0), phase)

    # Replicate+scale on the MXU.  Split x into three chunks whose values are
    # exactly representable in bf16; since the band entries are exact powers of
    # two, every partial product is exact whatever precision the MXU matmul uses.
    x = x_ref[...].astype(jnp.float32)
    x_hi = x.astype(jnp.bfloat16).astype(jnp.float32)
    r = x - x_hi
    x_mid = r.astype(jnp.bfloat16).astype(jnp.float32)
    x_lo = r - x_mid

    def mm(a):
        return jnp.dot(a, band_mat, preferred_element_type=jnp.float32)

    z = mm(x_hi) + mm(x_mid) + mm(x_lo)

    # Single lane-dense transcendental; cos(z) = sin(z + pi/2).
    o_ref[...] = jnp.sin(z + phase).astype(o_ref.dtype)


class SinCosEncoder:
    """JAX/Pallas re-implementation of the PyTorch SinCosEncoder."""

    def __init__(self, sin_cos_freq_bands: int, tile_rows: int = 4096):
        self.num_bands = int(sin_cos_freq_bands)
        # 2.0 ** linspace(0, F-1, F)  ->  [1, 2, 4, ..., 2^(F-1)]
        self.freq_bands = tuple(
            float(2.0 ** f)
            for f in np.linspace(0.0, self.num_bands - 1, self.num_bands))
        self.tile_rows = int(tile_rows)

    def __call__(self, features: jax.Array) -> jax.Array:
        orig_shape = features.shape
        c = int(orig_shape[-1])
        n = 1
        for d in orig_shape[:-1]:
            n *= int(d)
        f = self.num_bands
        out_c = 2 * f * c

        # Lane-dense output stores: if out_c is not a multiple of 128, fold `fold`
        # logical rows into the lane axis (wrapper-side reshapes of contiguous data).
        fold = 1 if out_c % 128 == 0 else 128 // math.gcd(out_c, 128)

        x2d = features.reshape(n, c)
        n_pad = ((n + fold - 1) // fold) * fold
        if n_pad != n:
            x2d = jnp.pad(x2d, ((0, n_pad - n), (0, 0)))
        rows = n_pad // fold
        x_fold = x2d.reshape(rows, fold * c)

        # Row-tile: <= tile_rows, at least 2 grid steps when possible (so the
        # "parallel" axis shards across v7x's two TensorCores), and a
        # double-buffered footprint well under the scoped-VMEM budget.
        tile_cap = max(8, (self.tile_rows // 8) * 8)
        half_cap = ((-(-rows // 2)) + 7) // 8 * 8          # round_up(cdiv(rows,2), 8)
        bytes_per_row = 2 * 4 * fold * (c + out_c)         # double-buffered in+out, f32
        vmem_budget = 24 * 1024 * 1024
        vmem_cap = max(8, (vmem_budget // bytes_per_row) // 8 * 8)
        tm = max(8, min(tile_cap, half_cap, vmem_cap))
        grid = (pl.cdiv(rows, tm),)

        kernel = functools.partial(
            _sincos_kernel, chans=c, out_chans=out_c, num_bands=f, fold=fold)

        out_fold = pl.pallas_call(
            kernel,
            out_shape=jax.ShapeDtypeStruct((rows, fold * out_c), features.dtype),
            grid_spec=pltpu.PrefetchScalarGridSpec(
                num_scalar_prefetch=0,
                grid=grid,
                in_specs=[pl.BlockSpec((tm, fold * c), lambda i: (i, 0))],
                out_specs=pl.BlockSpec((tm, fold * out_c), lambda i: (i, 0)),
            ),
            compiler_params=pltpu.CompilerParams(
                dimension_semantics=("parallel",),
                # Explicit budget so the same tiling is safe on v7x (64 MiB
                # physical); the tm computation above keeps the footprint
                # comfortably under this limit on all generations.
                vmem_limit_bytes=32 * 1024 * 1024,
            ),
        )(x_fold)

        out2d = out_fold.reshape(n_pad, out_c)
        if n_pad != n:
            out2d = out2d[:n]
        return out2d.reshape(*orig_shape[:-1], out_c)


def _reference(features, freq_bands):
    # Pure-JAX reference mirroring the PyTorch code.
    sins = jnp.concatenate([jnp.sin(features * fb) for fb in freq_bands], axis=-1)
    coss = jnp.concatenate([jnp.cos(features * fb) for fb in freq_bands], axis=-1)
    return jnp.concatenate([sins, coss], axis=-1)


if __name__ == "__main__":
    # cfg.NETWORK.GANCRAFT.SIN_COS_FREQ_BENDS = 4
    FREQ_BANDS = 4
    B, S, C = 2, 8, 16  # features: (batch, seq, channels) -> out_c = 128 (lane dense)

    key = jax.random.PRNGKey(0)
    features = jax.random.normal(key, (B, S, C), dtype=jnp.float32)

    encoder = SinCosEncoder(FREQ_BANDS)
    out = jax.block_until_ready(encoder(features))

    expected = _reference(features, encoder.freq_bands)
    assert out.shape == (B, S, 2 * FREQ_BANDS * C), out.shape
    assert out.dtype == features.dtype, out.dtype
    assert jnp.allclose(out, expected, atol=1e-5, rtol=1e-5)

    # Multi-tile path (grid > 1) with a partial final row block.
    enc_small_tile = SinCosEncoder(FREQ_BANDS, tile_rows=8)
    feats2 = jax.random.normal(jax.random.PRNGKey(1), (3, 7, C), jnp.float32)
    out2 = jax.block_until_ready(enc_small_tile(feats2))
    assert out2.shape == (3, 7, 2 * FREQ_BANDS * C), out2.shape
    assert jnp.allclose(out2, _reference(feats2, enc_small_tile.freq_bands),
                        atol=1e-5, rtol=1e-5)

    # Narrow-channel path: C=8 -> out_c=64, rows folded 2-per-lane-group so the
    # output stores stay lane dense; also exercises the row padding/slice path.
    feats3 = jax.random.normal(jax.random.PRNGKey(2), (3, 5, 8), jnp.float32)
    out3 = jax.block_until_ready(encoder(feats3))
    assert out3.shape == (3, 5, 2 * FREQ_BANDS * 8), out3.shape
    assert jnp.allclose(out3, _reference(feats3, encoder.freq_bands),
                        atol=1e-5, rtol=1e-5)

    print("KERNEL_OK")
</pallas_src>

<mosaic_0001>
module attributes {stable_mosaic.version = 11 : i64} {
  func.func @_sincos_kernel(%arg0: i32, %arg1: memref<8x16xf32, #tpu.memory_space<vmem>>, %arg2: memref<8x128xf32, #tpu.memory_space<vmem>>) attributes {dimension_semantics = [#tpu.dimension_semantics<parallel>], iteration_bounds = array<i64: 2>, scalar_prefetch = 0 : i64, scratch_operands = 0 : i64, tpu.core_type = #tpu.core_type<tc>, window_params = [{transform_indices = @transform_0, window_bounds = array<i64: 8, 16>}, {transform_indices = @transform_1, window_bounds = array<i64: 8, 128>}]} {
    %0 = tpu.iota {dimensions = array<i32: 0>} : vector<16x128xi32>
    %1 = tpu.iota {dimensions = array<i32: 1>} : vector<16x128xi32>
    %cst = arith.constant 0.000000e+00 : f32
    %2 = vector.broadcast %cst : f32 to vector<16x128xf32>
    %c0_i32 = arith.constant 0 : i32
    %3 = vector.broadcast %c0_i32 : i32 to vector<16x128xi32>
    %4 = arith.cmpi sge, %0, %3 : vector<16x128xi32>
    %c16_i32 = arith.constant 16 : i32
    %5 = vector.broadcast %c16_i32 : i32 to vector<16x128xi32>
    %6 = arith.cmpi slt, %0, %5 : vector<16x128xi32>
    %7 = arith.andi %4, %6 : vector<16x128xi1>
    %c0_i32_0 = arith.constant 0 : i32
    %8 = vector.broadcast %c0_i32_0 : i32 to vector<16x128xi32>
    %9 = arith.addi %0, %8 : vector<16x128xi32>
    %10 = arith.cmpi eq, %1, %9 : vector<16x128xi32>
    %11 = arith.andi %7, %10 : vector<16x128xi1>
    %cst_1 = arith.constant 1.000000e+00 : f32
    %12 = vector.broadcast %cst_1 : f32 to vector<16x128xf32>
    %13 = arith.select %11, %12, %2 : vector<16x128xi1>, vector<16x128xf32>
    %c16_i32_2 = arith.constant 16 : i32
    %14 = vector.broadcast %c16_i32_2 : i32 to vector<16x128xi32>
    %15 = arith.addi %0, %14 : vector<16x128xi32>
    %16 = arith.cmpi eq, %1, %15 : vector<16x128xi32>
    %17 = arith.andi %7, %16 : vector<16x128xi1>
    %cst_3 = arith.constant 2.000000e+00 : f32
    %18 = vector.broadcast %cst_3 : f32 to vector<16x128xf32>
    %19 = arith.select %17, %18, %13 : vector<16x128xi1>, vector<16x128xf32>
    %c32_i32 = arith.constant 32 : i32
    %20 = vector.broadcast %c32_i32 : i32 to vector<16x128xi32>
    %21 = arith.addi %0, %20 : vector<16x128xi32>
    %22 = arith.cmpi eq, %1, %21 : vector<16x128xi32>
    %23 = arith.andi %7, %22 : vector<16x128xi1>
    %cst_4 = arith.constant 4.000000e+00 : f32
    %24 = vector.broadcast %cst_4 : f32 to vector<16x128xf32>
    %25 = arith.select %23, %24, %19 : vector<16x128xi1>, vector<16x128xf32>
    %c48_i32 = arith.constant 48 : i32
    %26 = vector.broadcast %c48_i32 : i32 to vector<16x128xi32>
    %27 = arith.addi %0, %26 : vector<16x128xi32>
    %28 = arith.cmpi eq, %1, %27 : vector<16x128xi32>
    %29 = arith.andi %7, %28 : vector<16x128xi1>
    %cst_5 = arith.constant 8.000000e+00 : f32
    %30 = vector.broadcast %cst_5 : f32 to vector<16x128xf32>
    %31 = arith.select %29, %30, %25 : vector<16x128xi1>, vector<16x128xf32>
    %c64_i32 = arith.constant 64 : i32
    %32 = vector.broadcast %c64_i32 : i32 to vector<16x128xi32>
    %33 = arith.addi %0, %32 : vector<16x128xi32>
    %34 = arith.cmpi eq, %1, %33 : vector<16x128xi32>
    %35 = arith.andi %7, %34 : vector<16x128xi1>
    %cst_6 = arith.constant 1.000000e+00 : f32
    %36 = vector.broadcast %cst_6 : f32 to vector<16x128xf32>
    %37 = arith.select %35, %36, %31 : vector<16x128xi1>, vector<16x128xf32>
    %c80_i32 = arith.constant 80 : i32
    %38 = vector.broadcast %c80_i32 : i32 to vector<16x128xi32>
    %39 = arith.addi %0, %38 : vector<16x128xi32>
    %40 = arith.cmpi eq, %1, %39 : vector<16x128xi32>
    %41 = arith.andi %7, %40 : vector<16x128xi1>
    %cst_7 = arith.constant 2.000000e+00 : f32
    %42 = vector.broadcast %cst_7 : f32 to vector<16x128xf32>
    %43 = arith.select %41, %42, %37 : vector<16x128xi1>, vector<16x128xf32>
    %c96_i32 = arith.constant 96 : i32
    %44 = vector.broadcast %c96_i32 : i32 to vector<16x128xi32>
    %45 = arith.addi %0, %44 : vector<16x128xi32>
    %46 = arith.cmpi eq, %1, %45 : vector<16x128xi32>
    %47 = arith.andi %7, %46 : vector<16x128xi1>
    %cst_8 = arith.constant 4.000000e+00 : f32
    %48 = vector.broadcast %cst_8 : f32 to vector<16x128xf32>
    %49 = arith.select %47, %48, %43 : vector<16x128xi1>, vector<16x128xf32>
    %c112_i32 = arith.constant 112 : i32
    %50 = vector.broadcast %c112_i32 : i32 to vector<16x128xi32>
    %51 = arith.addi %0, %50 : vector<16x128xi32>
    %52 = arith.cmpi eq, %1, %51 : vector<16x128xi32>
    %53 = arith.andi %7, %52 : vector<16x128xi1>
    %cst_9 = arith.constant 8.000000e+00 : f32
    %54 = vector.broadcast %cst_9 : f32 to vector<16x128xf32>
    %55 = arith.select %53, %54, %49 : vector<16x128xi1>, vector<16x128xf32>
    %56 = tpu.iota {dimensions = array<i32: 1>} : vector<1x128xi32>
    %cst_10 = arith.constant 0.000000e+00 : f32
    %57 = vector.broadcast %cst_10 : f32 to vector<1x128xf32>
    %c64_i32_11 = arith.constant 64 : i32
    %58 = vector.broadcast %c64_i32_11 : i32 to vector<1x128xi32>
    %59 = arith.cmpi sge, %56, %58 : vector<1x128xi32>
    %c128_i32 = arith.constant 128 : i32
    %60 = vector.broadcast %c128_i32 : i32 to vector<1x128xi32>
    %61 = arith.cmpi slt, %56, %60 : vector<1x128xi32>
    %62 = arith.andi %59, %61 : vector<1x128xi1>
    %cst_12 = arith.constant 1.57079637 : f32
    %63 = vector.broadcast %cst_12 : f32 to vector<1x128xf32>
    %64 = arith.select %62, %63, %57 : vector<1x128xi1>, vector<1x128xf32>
    %c0 = arith.constant 0 : index
    %c0_13 = arith.constant 0 : index
    %65 = vector.load %arg1[%c0, %c0_13] : memref<8x16xf32, #tpu.memory_space<vmem>>, vector<8x16xf32>
    %66 = arith.truncf %65 : vector<8x16xf32> to vector<8x16xbf16>
    %67 = arith.extf %66 : vector<8x16xbf16> to vector<8x16xf32>
    %68 = arith.subf %65, %67 : vector<8x16xf32>
    %69 = arith.truncf %68 : vector<8x16xf32> to vector<8x16xbf16>
    %70 = arith.extf %69 : vector<8x16xbf16> to vector<8x16xf32>
    %71 = arith.subf %68, %70 : vector<8x16xf32>
    %cst_14 = arith.constant dense<0.000000e+00> : vector<8x128xf32>
    %72 = tpu.matmul %67, %55, %cst_14 {dimension_numbers = #tpu.dot_dimension_numbers<[1], [0], [0], [1], [0, 0, 1, 1], [], []>} : vector<8x16xf32>, vector<16x128xf32>, vector<8x128xf32> -> vector<8x128xf32>
    %cst_15 = arith.constant dense<0.000000e+00> : vector<8x128xf32>
    %73 = tpu.matmul %70, %55, %cst_15 {dimension_numbers = #tpu.dot_dimension_numbers<[1], [0], [0], [1], [0, 0, 1, 1], [], []>} : vector<8x16xf32>, vector<16x128xf32>, vector<8x128xf32> -> vector<8x128xf32>
    %74 = arith.addf %72, %73 : vector<8x128xf32>
    %cst_16 = arith.constant dense<0.000000e+00> : vector<8x128xf32>
    %75 = tpu.matmul %71, %55, %cst_16 {dimension_numbers = #tpu.dot_dimension_numbers<[1], [0], [0], [1], [0, 0, 1, 1], [], []>} : vector<8x16xf32>, vector<16x128xf32>, vector<8x128xf32> -> vector<8x128xf32>
    %76 = arith.addf %74, %75 : vector<8x128xf32>
    %77 = vector.broadcast %64 : vector<1x128xf32> to vector<8x128xf32>
    %78 = arith.addf %76, %77 : vector<8x128xf32>
    %79 = math.sin %78 : vector<8x128xf32>
    %c0_17 = arith.constant 0 : index
    %c0_18 = arith.constant 0 : index
    %80 = vector.load %arg2[%c0_17, %c0_18] : memref<8x128xf32, #tpu.memory_space<vmem>>, vector<8x128xf32>
    tpu.vector_store %arg2[%c0_17, %c0_18], %79 {strides = array<i32>} : memref<8x128xf32, #tpu.memory_space<vmem>>, vector<8x128xf32>,
    return
  }
  func.func @transform_0(%arg0: i32) -> (i32, i32) {
    %c0_i32 = arith.constant 0 : i32
    %c0_i32_0 = arith.constant 0 : i32
    return %arg0, %c0_i32 : i32, i32
  }
  func.func @transform_1(%arg0: i32) -> (i32, i32) {
    %c0_i32 = arith.constant 0 : i32
    %c0_i32_0 = arith.constant 0 : i32
    return %arg0, %c0_i32 : i32, i32
  }
}

</mosaic_0001>

<bundles_post_ra>
// kernel: tpu_custom_call.1
= control target key start
LH: loop header
LB: loop body
LE: loop exit
PB: predicated region body
PF: predicated region fallthrough
CT: control target
= control target key end

     0   :  { %6 = vsyncpa [#allocation3], 0  ;;  %s1087_s0 = inlined_call_operand.hbm [shape: f32[16,16], index: 0, kind: input, shape index: {}]   ;;  %s1088_s1 = inlined_call_operand.hbm [shape: f32[16,128], index: 1, kind: output, shape index: {}]  }
   0x1   :  { %8 = vsyncpa [#allocation3 + $0x1], 0 }
   0x2   :  { %9 = vsyncpa [#allocation4], 0 }
   0x3   :  { %11 = vsyncpa [#allocation4 + $0x1], 0  ;;  %s867_s6 = smov 0   ;;  %s869_s7 = smov 0  }
   0x4   :  { %s871_s8 = smov 0   ;;  %s873_s9 = smov 0  }
   0x5 LB: > { %s888_s10 = sadd.s32 4294967295, %s844_s9   ;;  %s627_s11 = sadd.s32 4294967294, %s844_s9   ;;  %s844_s9 = sphi %s873_s9, %s1103_s9   ;;  %s840_s8 = sphi %s871_s8, %s1102_s8   ;;  %s836_s7 = sphi %s869_s7, %s1101_s7   ;;  %s832_s6 = sphi %s867_s6, %s1100_s6  }
   0x6   : > { %s892_s12 = sadd.s32 1, %s844_s9   ;;  %s24_s13 = sadd.s32 1, %s840_s8 }
   0x7   : > { %s21_s14 = ssub.s32 %s844_s9, %s892_s12  ;;  %p31_p0 = scmp.ne.s32.totalorder %s840_s8, %s836_s7 }
   0x8   : > { %p22_p1 = scmp.eq.s32.totalorder %s21_s14, 0  ;;  %p32_p2 = scmp.eq.s32.totalorder %s844_s9, 0 }
   0x9   : > { %p37_p3 = scmp.ne.s32.totalorder %s836_s7, %s832_s6  ;;  %p38_p4 = scmp.eq.s32.totalorder %s888_s10, 0 }
   0xa   : > { %s904_s15 = scalar_select %p22_p1, %s840_s8, %s24_s13  }
   0xb   : > { %p906_p5 = por %p32_p2, %p31_p0  ;;  %p910_p6 = por %p38_p4, %p37_p3 }
   0xc   : > { %p61_p7 = scmp.eq.s32.totalorder %s888_s10, 1  ;;  %p67_p8 = scmp.eq.s32.totalorder %s627_s11, 1 }
   0xd   : > { %p701_p10 = scmp.lt.s32.totalorder %s844_s9, 2  ;;  %s87_s20 = sand.u32 1, %s840_s8  }
   0xe   : > { %p917_p11 = por %p61_p7, %p31_p0  ;;  %p921_p12 = por %p67_p8, %p37_p3 }
   0xf   : > { %s631_s21 = sshll.u32 %s844_s9, 7  ;;  %s630_s22 = sshll.u32 %s87_s20, 3 }
  0x10   : > { %s1092_s18 = scalar_select %p917_p11, 1, 0 }
  0x11   : > { %s1093_s19 = scalar_select %p921_p12, 1, 0 }
  0x12   : > { %s930_s25 = scalar_lea.hbm %s1087_s0, %s631_s21  ;;  %s91_s26 = scalar_lea.vmem [#allocation2], %s630_s22 }
  0x13   : > { %s98_s27 = sshll.u32 %s91_s26, 4  ;;  %p934_p13 = pnand %p701_p10, %p906_p5  ;;  %s938_s27 = int_to_ptr.vmem [resolvable:$true] %s98_s27 }
  0x14   : > { %s88_s29 = scalar_lea.sflag [#allocation3], %s87_s20  ;;  %s748_s30 = scalar_lea.hbm %s930_s25, 128 }
  0x15   : > { %p749_p2 = scmp.ne.s32.totalorder %s930_s25, %s748_s30  ;;  %p750_p3 = pneg %p934_p13 }
  0x16   : > { %s753_s4 = scalar_lea.hbm %s1087_s0, 256  ;;  %p754_p5 = scmp.lt.u32.totalorder %s930_s25, %s1087_s0 }
  0x17   : > { %p751_p4 = pnand %p750_p3, %p749_p2  ;;  %p755_p8 = scmp.lt.u32.totalorder %s753_s4, %s748_s30 }
  0x18   : > { %p757_p9 = scmp.lt.u32.totalorder %s748_s30, %s930_s25 }
  0x19   : > { %p752_p7 = pneg %p751_p4  ;;  %p756_p10 = por %p755_p8, %p754_p5 }
  0x1b   : > { %p758_p0 = por %p757_p9, %p756_p10 }
  0x1d   : > { %p759_p1 = pnand %p758_p0, %p752_p7 }
  0x1f   : > { %762 = shalt.err (!%p759_p1)
}
  0x20   : > { %s763_s13 = scalar_lea.vmem %s938_s27, 128  ;;  %s846_s14 = smov [#allocation2]  }
  0x21   : > { %p764_p2 = scmp.ne.s32.totalorder %s938_s27, %s763_s13  ;;  %s768_s16 = sshll.u32 %s846_s14, 4  ;;  %s769_s16 = int_to_ptr.vmem [resolvable:$false] %s768_s16 }
  0x22   : > { %s770_s20 = scalar_lea.vmem %s769_s16, 256  ;;  %p771_p11 = scmp.lt.s32.totalorder %s938_s27, %s769_s16 }
  0x23   : > { %p766_p4 = pnand %p764_p2, %p750_p3  ;;  %p772_p5 = scmp.lt.s32.totalorder %s770_s20, %s763_s13 }
  0x25   : > { %p767_p12 = pneg %p766_p4  ;;  %p773_p8 = por %p772_p5, %p771_p11 }
  0x27   : > { %p774_p9 = pnand %p773_p8, %p767_p12 }
  0x29   : > { %777 = shalt.err (!%p774_p9)
}
  0x2a   : > { %696 = dma.hbm_to_vmem [thread:$0]  (!%p934_p13), %s930_s25, 128, %s938_s27, %s88_s29  }
  0x2b   : > { %p1095_p0 = scmp.lt.s32.totalorder %s844_s9, 3  ;;  %p1096_p1 = scmp.ge.s32.totalorder %s844_s9, 1 }
  0x2d   : > { %p104_p3 = pnand %p1096_p1, %p1095_p0 }
  0x2e   : > { %s972_s21 = sand.u32 (!%p104_p3), 1, %s836_s7  }
  0x2f   : > { %107 = sbr.rel (%p104_p3) target bundleno = 390 (0x186), region = 24  ;;  %s633_s22 = sshll.u32 (!%p104_p3), %s972_s21, 3 }
  0x30   : > { %s110_s23 = scalar_lea.sflag (!%p104_p3), [#allocation3], %s972_s21  ;;  %s978_s24 = scalar_lea.vmem (!%p104_p3), [#allocation2], %s633_s22 }
  0x36   : > { %823 = dma.done.wait (%p910_p6), %s110_s23, 128  }
  0x37   : > { %825 = vsyncadd (%p910_p6), %s110_s23, 4294967168  ;;  %v132_v0 = vlaneseq  ;;  %v847_v1 = vmov 0.0|0.0   ;;  %vm848_vm0 = vmmov 0   ;;  %v849_v4 = vmov 0.0   ;;  %v209_v26 = vld [vmem:[%s978_s24] sm:$0xff]  ;;  %s643_s17 = sshll.u32 %s888_s10, 7 }
  0x38   : > { %676 = vmatprep.subr.bf16.mxu0 %v847_v1  ;;  %679 = vmatprep.subr.bf16.mxu1 %v847_v1  ;;  %v210_v34 = vpack.c.bf16 %v209_v26, %v209_v26  ;;  %s131_s25 = scalar_lea.vmem [#allocation5], %s633_s22  ;;  %s1043_s29 = scalar_lea.hbm %s1088_s1, %s643_s17 }
  0x39   : > { %v133_v2 = vshrl.u32 %v132_v0, 7  ;;  %v986_v3 = vand.u32 127, %v132_v0  ;;  %659 = vmatprep.mubr.msk.f32.mxu0 %vm848_vm0, %v849_v4  ;;  %666 = vmatprep.mubr.msk.f32.mxu1 %vm848_vm0, %v849_v4  ;;  %v850_v0 = vmov 683565275   ;;  %s557_s26 = sshll.u32 %s131_s25, 4  ;;  %s544_s10 = scalar_lea.sflag [#allocation4], %s972_s21  ;;  %s1045_s26 = int_to_ptr.vmem [resolvable:$true] %s557_s26 }
  0x3a   : > { %v211_v38 = vunpack.c.l.bf16 %v210_v34  ;;  %s778_s30 = scalar_lea.vmem %s1045_s26, 128  ;;  %p1097_p11 = scmp.ne.s32.totalorder %s1092_s18, 0 }
  0x3b   : > { %v134_v5 = vadd.s32 8, %v133_v2  ;;  %vm143_vm1 = vcmp.eq.s32.totalorder %v986_v3, %v133_v2  ;;  %v149_v6 = vadd.s32 16, %v133_v2  ;;  %v157_v7 = vadd.s32 32, %v133_v2  ;;  %p779_p6 = scmp.ne.s32.totalorder %s1045_s26, %s778_s30  ;;  %s856_s2 = smov [#allocation5]  }
  0x3c   : > { %v147_v8 = vsel %vm143_vm1, 1.0, %v849_v4  ;;  %v165_v9 = vadd.s32 48, %v133_v2  ;;  %v173_v10 = vadd.s32 64, %v133_v2  ;;  %v181_v11 = vadd.s32 80, %v133_v2  ;;  %s782_s3 = sshll.u32 %s856_s2, 4  ;;  %s783_s3 = int_to_ptr.vmem [resolvable:$false] %s782_s3 }
  0x3d   : > { %vm144_vm2 = vcmp.eq.s32.totalorder %v986_v3, %v134_v5  ;;  %v150_v12 = vadd.s32 16, %v134_v5  ;;  %vm151_vm3 = vcmp.eq.s32.totalorder %v986_v3, %v149_v6  ;;  %v158_v13 = vadd.s32 32, %v134_v5  ;;  %p780_p12 = pnand %p779_p6, %p1097_p11  ;;  %s784_s4 = scalar_lea.vmem %s783_s3, 256 }
  0x3e   : > { %v148_v14 = vsel %vm144_vm2, 1.0, %v849_v4  ;;  %v155_v15 = vsel %vm151_vm3, 2.0, %v147_v8  ;;  %vm159_vm4 = vcmp.eq.s32.totalorder %v986_v3, %v157_v7  ;;  %v166_v16 = vadd.s32 48, %v134_v5  ;;  %p785_p7 = scmp.lt.s32.totalorder %s1045_s26, %s783_s3  ;;  %p786_p10 = scmp.lt.s32.totalorder %s784_s4, %s778_s30 }
  0x3f   : > { %vm152_vm5 = vcmp.eq.s32.totalorder %v986_v3, %v150_v12  ;;  %vm160_vm6 = vcmp.eq.s32.totalorder %v986_v3, %v158_v13  ;;  %v163_v17 = vsel %vm159_vm4, 4.0, %v155_v15  ;;  %vm167_vm7 = vcmp.eq.s32.totalorder %v986_v3, %v165_v9  ;;  %p781_p13 = pneg %p780_p12 }
  0x40   : > { %v156_v18 = vsel %vm152_vm5, 2.0, %v148_v14  ;;  %vm168_vm8 = vcmp.eq.s32.totalorder %v986_v3, %v166_v16  ;;  %v171_v19 = vsel %vm167_vm7, 8.0, %v163_v17  ;;  %v174_v20 = vadd.s32 64, %v134_v5  ;;  %p787_p2 = por %p786_p10, %p785_p7 }
  0x41   : > { %v164_v21 = vsel %vm160_vm6, 4.0, %v156_v18  ;;  %vm175_vm9 = vcmp.eq.s32.totalorder %v986_v3, %v173_v10  ;;  %v182_v22 = vadd.s32 80, %v134_v5  ;;  %vm183_vm10 = vcmp.eq.s32.totalorder %v986_v3, %v181_v11 }
  0x42   : > { %v172_v23 = vsel %vm168_vm8, 8.0, %v164_v21  ;;  %vm176_vm11 = vcmp.eq.s32.totalorder %v986_v3, %v174_v20  ;;  %v179_v24 = vsel %vm175_vm9, 1.0, %v171_v19  ;;  %v189_v25 = vadd.s32 96, %v133_v2  ;;  %p788_p4 = pnand %p787_p2, %p781_p13 }
  0x43   : > { %v180_v27 = vsel %vm176_vm11, 1.0, %v172_v23  ;;  %vm184_vm12 = vcmp.eq.s32.totalorder %v986_v3, %v182_v22  ;;  %v187_v28 = vsel %vm183_vm10, 2.0, %v179_v24  ;;  %v190_v29 = vadd.s32 96, %v134_v5 }
  0x44   : > { %v188_v30 = vsel %vm184_vm12, 2.0, %v180_v27  ;;  %vm191_vm13 = vcmp.eq.s32.totalorder %v986_v3, %v189_v25  ;;  %v197_v31 = vadd.s32 112, %v133_v2  ;;  %v198_v32 = vadd.s32 112, %v134_v5 }
  0x45   : > { %vm192_vm14 = vcmp.eq.s32.totalorder %v986_v3, %v190_v29  ;;  %v195_v33 = vsel %vm191_vm13, 4.0, %v187_v28  ;;  %v212_v40 = vsub.f32 %v209_v26, %v211_v38  ;;  %vm216_vm2 = vcmask 130048  }
  0x46   : > { %v196_v35 = vsel %vm192_vm14, 4.0, %v188_v30  ;;  %vm199_vm15 = vcmp.eq.s32.totalorder %v986_v3, %v197_v31  ;;  %vm200_vm1 = vcmp.eq.s32.totalorder %v986_v3, %v198_v32  ;;  %vm205_vm3 = vcmp.ge.s32.totalorder %v986_v3, 64 }
  0x47   : > { %v203_v36 = vsel %vm199_vm15, 8.0, %v195_v33  ;;  %v204_v37 = vsel %vm200_vm1, 8.0, %v196_v35  ;;  %v213_v41 = vpack.c.bf16 %v212_v40, %v212_v40  ;;  %v208_v49 = vsel %vm205_vm3, 1.5707964, %v849_v4 }
  0x48   : > { %v677_v39 = vpack.c.bf16 %v204_v37, %v203_v36  ;;  %v851_v2 = vmov 2475754826   ;;  %v852_v5 = vmov 2131351028   ;;  %v853_v8 = vmov 2102212464  }
  0x49   : > { %v214_v42 = vunpack.c.l.bf16 %v213_v41  ;;  %v854_v11 = vmov 920167782   ;;  %v855_v14 = vmov 1326507024  }
  0x4a   : > { %678 = vmatpush3.bf16.msra.mxu0 %v677_v39  ;;  %681 = vmatpush3.bf16.msra.mxu1 %v677_v39 }
  0x4b   : > { %682 = vmatprep.subr.bf16.mxu0 %v847_v1  ;;  %v215_v43 = vsub.f32 %v212_v40, %v214_v42 }
  0x4d   : > { %667 = vmatmul.mubr.msk.f32.vlgmr.msra.gmra.mrb[0].mxu1 %vm216_vm2, %v211_v38  ;;  %660 = vmatmul.mubr.msk.f32.vlgmr.msra.gmra.mrb[0].mxu0 %vm216_vm2, %v214_v42 }
  0x4e   : > { %684 = vmatpush3.bf16.msra.mxu0 %v677_v39  ;;  %673 = vmatprep.mubr.msk.f32.mxu0 %vm848_vm0, %v849_v4 }
  0x51   : > { %674 = vmatmul.mubr.msk.f32.vlgmr.msra.gmra.mrb[2].mxu0 %vm216_vm2, %v215_v43 }
 0x120   : > { %v359_v44 = vpop.f32.mrb[0].mxu1  ;;  %v286_v46 = vpop.f32.mrb[0].mxu0 }
 0x121   : > { %v668_v45 = vpop.f32.mrb[1].mxu1  ;;  %v661_v47 = vpop.f32.mrb[1].mxu0  ;;  %v360_v48 = vadd.f32 %v359_v44, %v286_v46 }
 0x124   : > { %v432_v50 = vpop.f32.mrb[2].mxu0 }
 0x125   : > { %v436_v51 = vadd.f32 %v432_v50, %v360_v48  ;;  %v675_v52 = vpop.f32.mrb[3].mxu0 }
 0x127   : > { %v1016_v53 = vadd.f32 %v436_v51, %v208_v49 }
 0x129   : > { %v441_v54 = vand.u32 2139095040, %v1016_v53  ;;  %v438_v58 = vand.u32 2147483647, %v1016_v53  ;;  %vm440_vm10 = vcmp.lt.s32.totalorder %v1016_v53, 0  ;;  %vm530_vm15 = vweird.f32 %v1016_v53 }
 0x12b   : > { %v442_v55 = vshrl.u32 %v441_v54, 23  ;;  %v445_v61 = vand.u32 8388607, %v438_v58  ;;  %vm439_vm11 = vcmp.le.f32.partialorder %v438_v58, 0.7853982 }
 0x12d   : > { %v638_v56 = vadd.s32 4294967169, %v442_v55  ;;  %v446_v16 = vor.u32 8388608, %v445_v61 }
 0x12f   : > { %v448_v57 = vadd.s32 1, %v638_v56  ;;  %v486_v30 = vshll.u32 %v446_v16, 8 }
 0x131   : > { %vm449_vm0 = vcmp.gt.s32.totalorder %v448_v57, 0 }
 0x132   : > { %v450_v59 = vsel %vm449_vm0, %v448_v57, 0 }
 0x133   : > { %v452_v60 = vand.u32 31, %v450_v59  ;;  %v451_v63 = vshrl.u32 %v450_v59, 5 }
 0x135   : > { %v453_v62 = vsub.s32 32, %v452_v60  ;;  %v455_v1 = vshll.u32 %v850_v0, %v452_v60  ;;  %v458_v3 = vshll.u32 %v851_v2, %v452_v60  ;;  %v461_v7 = vshll.u32 %v852_v5, %v452_v60 }
 0x136   : > { %v464_v10 = vshll.u32 %v853_v8, %v452_v60  ;;  %v467_v13 = vshll.u32 %v854_v11, %v452_v60  ;;  %vm470_vm4 = vcmp.lt.s32.totalorder %v451_v63, 1  ;;  %vm473_vm5 = vcmp.lt.s32.totalorder %v451_v63, 4 }
 0x137   : > { %v456_v4 = vshrl.u32 %v851_v2, %v453_v62  ;;  %v459_v6 = vshrl.u32 %v852_v5, %v453_v62  ;;  %v462_v9 = vshrl.u32 %v853_v8, %v453_v62  ;;  %v465_v12 = vshrl.u32 %v854_v11, %v453_v62 }
 0x138   : > { %v468_v15 = vshrl.u32 %v855_v14, %v453_v62  ;;  %v454_v25 = vshrl.u32 %v850_v0, %v453_v62  ;;  %vm472_vm6 = vcmp.lt.s32.totalorder %v451_v63, 3  ;;  %vm471_vm7 = vcmp.lt.s32.totalorder %v451_v63, 2 }
 0x139   : > { %v457_v17 = vor.u32 %v456_v4, %v455_v1  ;;  %v460_v18 = vor.u32 %v459_v6, %v458_v3  ;;  %v463_v19 = vor.u32 %v462_v9, %v461_v7  ;;  %v466_v20 = vor.u32 %v465_v12, %v464_v10 }
 0x13a   : > { %v469_v21 = vor.u32 %v468_v15, %v467_v13 }
 0x13b   : > { %v475_v22 = vsel %vm473_vm5, %v463_v19, 2102212464  ;;  %v478_v23 = vsel %vm470_vm4, %v457_v17, %v460_v18  ;;  %v482_v24 = vsel %vm470_vm4, %v460_v18, %v463_v19  ;;  %v479_v26 = vsel %vm473_vm5, %v466_v20, 920167782 }
 0x13c   : > { %v483_v27 = vsel %vm473_vm5, %v469_v21, 1326507024  ;;  %v480_v28 = vsel %vm472_vm6, %v463_v19, %v479_v26  ;;  %v474_v31 = vsel %vm470_vm4, %v454_v25, %v457_v17  ;;  %v476_v32 = vsel %vm472_vm6, %v460_v18, %v475_v22 }
 0x13d   : > { %v484_v29 = vsel %vm472_vm6, %v466_v20, %v483_v27  ;;  %v481_v33 = vsel %vm471_vm7, %v478_v23, %v480_v28  ;;  %v477_v39 = vsel %vm471_vm7, %v474_v31, %v476_v32 }
 0x13e   : > { %v485_v34 = vsel %vm471_vm7, %v482_v24, %v484_v29  ;;  %v1025_v37 = vmul.u32.u64.low %v486_v30, %v481_v33  ;;  %v1026_v38 = vmul.u32.u64.high %v486_v30, %v481_v33, %v1025_v37  ;;  %v493_v41 = vmul.u32 %v486_v30, %v477_v39 }
 0x13f   : > { %v1022_v35 = vmul.u32.u64.low %v486_v30, %v485_v34  ;;  %v1023_v36 = vmul.u32.u64.high %v486_v30, %v485_v34, %v1022_v35 }
 0x140   : > { %v496_v40 = vadd.s32 1, %v1026_v38 }
 0x141   : > { %vm495_vm8 = vc.u32 %v1023_v36, %v1025_v37  ;;  %v494_v54 = vadd.s32 %v1025_v37, %v1023_v36 }
 0x142   : > { %v497_v42 = vsel %vm495_vm8, %v496_v40, %v1026_v38 }
 0x143   : > { %v498_v43 = vadd.s32 %v497_v42, %v493_v41 }
 0x145   : > { %v499_v44 = vadd.s32 536870912, %v498_v43 }
 0x147   : > { %v500_v45 = vshrl.u32 %v499_v44, 30 }
 0x149   : > { %v501_v46 = vshll.u32 %v500_v45, 30  ;;  %v524_v3 = vsub.s32 4, %v500_v45 }
 0x14b   : > { %v502_v47 = vsub.s32 %v498_v43, %v501_v46  ;;  %v525_v6 = vsel %vm440_vm10, %v524_v3, %v500_v45 }
 0x14c   : > { %v527_v8 = vsel %vm439_vm11, 0, %v525_v6 }
 0x14d   : > { %v504_v48 = vsub.s32 0, %v502_v47  ;;  %v531_v9 = vadd.s32 3, %v527_v8 }
 0x14f   : > { %v639_v49 = vmin.u32 %v504_v48, %v502_v47  ;;  %v532_v10 = vand.u32 3, %v531_v9 }
 0x151   : > { %v506_v50 = vclz %v639_v49  ;;  %vm537_vm12 = vcmp.eq.s32.totalorder %v532_v10, 2  ;;  %vm534_vm13 = vcmp.eq.s32.totalorder %v532_v10, 0  ;;  %vm533_vm14 = vcmp.lt.s32.totalorder %v532_v10, 2 }
 0x153   : > { %v640_v51 = vadd.s32 4294967294, %v506_v50 }
 0x155   : > { %vm641_vm9 = vcmp.lt.s32.totalorder %v640_v51, 0 }
 0x156   : > { %v509_v52 = vsel %vm641_vm9, 0, %v640_v51 }
 0x157   : > { %v510_v55 = vsub.s32 32, %v509_v52  ;;  %v514_v56 = vsub.s32 4294967266, %v509_v52  ;;  %v511_v57 = vshll.u32 %v502_v47, %v509_v52 }
 0x159   : > { %v512_v59 = vshrl.u32 %v494_v54, %v510_v55  ;;  %v515_v60 = vadd.s32 127, %v514_v56 }
 0x15b   : > { %v513_v61 = vor.u32 %v512_v59, %v511_v57  ;;  %v516_v62 = vshll.u32 %v515_v60, 23 }
 0x15d   : > { %v517_v63 = vor.u32 4788187, %v516_v62  ;;  %v520_v1 = vcvt.s32.f32 %v513_v61 }
 0x15f   : > { %v518_v0 = vand.u32 2147483647, %v517_v63 }
 0x161   : > { %v521_v2 = vmul.f32 %v520_v1, %v518_v0 }
 0x163   : > { %v522_v4 = vxor.u32 2147483648, %v521_v2 }
 0x165   : > { %v523_v5 = vsel %vm440_vm10, %v522_v4, %v521_v2 }
 0x166   : > { %v526_v7 = vsel %vm439_vm11, %v1016_v53, %v523_v5 }
 0x167   : > { %744 = vcosq.f32 %v526_v7 }
 0x168   : > { %746 = vsinq.f32 %v526_v7 }
 0x171   : > { %v745_v11 = vpop.eup %744 }
 0x172   : > { %v747_v12 = vpop.eup %746  ;;  %v538_v13 = vxor.u32 2147483648, %v745_v11 }
 0x173   : > { %v535_v14 = vxor.u32 2147483648, %v747_v12 }
 0x174   : > { %v539_v58 = vsel %vm537_vm12, %v538_v13, %v747_v12 }
 0x175   : > { %v536_v15 = vsel %vm534_vm13, %v745_v11, %v535_v14 }
 0x176   : > { %v540_v16 = vsel %vm533_vm14, %v536_v15, %v539_v58 }
 0x177   : > { %v541_v17 = vsel %vm530_vm15, nan, %v540_v16 }
 0x178   : > { %542 = vst [vmem:[%s131_s25] sm:$0xff] %v541_v17 }
 0x179   : > { %791 = shalt.err (!%p788_p4)
}
 0x17a   : > { %s792_s5 = scalar_lea.hbm %s1043_s29, 128  ;;  %s796_s14 = scalar_lea.hbm %s1088_s1, 256 }
 0x17b   : > { %p793_p5 = scmp.ne.s32.totalorder %s1043_s29, %s792_s5  ;;  %p797_p0 = scmp.lt.u32.totalorder %s1043_s29, %s1088_s1 }
 0x17c   : > { %p798_p1 = scmp.lt.u32.totalorder %s796_s14, %s792_s5  ;;  %p800_p6 = scmp.lt.u32.totalorder %s792_s5, %s1043_s29 }
 0x17d   : > { %p794_p8 = pnand %p793_p5, %p1097_p11 }
 0x17e   : > { %p799_p3 = por %p798_p1, %p797_p0 }
 0x17f   : > { %p795_p9 = pneg %p794_p8 }
 0x180   : > { %p801_p12 = por %p800_p6, %p799_p3 }
 0x182   : > { %p802_p13 = pnand %p801_p12, %p795_p9 }
 0x184   : > { %805 = shalt.err (!%p802_p13)
}
 0x185   : > { %691 = dma.vmem_to_hbm [thread:$0]  (%p1097_p11), %s1045_s26, 128, %s1043_s29, %s544_s10  }
 0x186 PF: > { %s569_s21 = sand.u32 1, %s832_s6   ;;  %p1098_p7 = scmp.ne.s32.totalorder %s1093_s19, 0 }
 0x187   : > { %p1099_p10 = scmp.ge.s32.totalorder %s844_s9, 2  ;;  %s570_s22 = scalar_lea.sflag [#allocation4], %s569_s21 }
 0x189   : > { %p698_p2 = pnand %p1099_p10, %p1098_p7 }
 0x18b   : > { %827 = dma.done.wait (!%p698_p2), %s570_s22, 128  }
 0x18c   : > { %829 = vsyncadd (!%p698_p2), %s570_s22, 4294967168  ;;  %p14_p4 = scmp.ge.s32.totalorder %s892_s12, 4   ;;  %s1100_s6 = smov %s836_s7 }
 0x18d   : > { %s1101_s7 = smov %s840_s8  ;;  %s1102_s8 = smov %s904_s15 }
 0x18e   : > { %s1103_s9 = smov %s892_s12  ;;  %16 = sbr.rel (!%p14_p4) target bundleno = 5 (0x5), region = 69 }
 0x195   :  { %575 = vsyncpa [#allocation3], 1 }
 0x196   :  { %577 = vsyncpa [#allocation3 + $0x1], 1 }
 0x197   :  { %578 = vsyncpa [#allocation4], 1 }
 0x198   :  { %580 = vsyncpa [#allocation4 + $0x1], 1 }

</bundles_post_ra>
